<compile_context>
chip_gen: v6e
topology: v6e:2x2x1
jax: 0.10.0
libtpu: 0.0.40
codegen_flags: <defaults>
</compile_context>

<pallas_src>
import functools

import jax
import jax.numpy as jnp
from jax.experimental import pallas as pl
from jax.experimental.pallas import tpu as pltpu


def _round_up(x, m):
    return ((x + m - 1) // m) * m


def _actor_kernel(
    x_ref,
    w1c_ref,              # fused layer 1 for both branches: (in, 2H)
    w2_ref, w3_ref,       # mean branch hidden layers (H, H)
    lw2_ref, lw3_ref,     # log_std branch hidden layers (H, H)
    wh_ref,               # fused output head (2H, out_w), columns pre-placed
    b_ref,                # all biases packed: (1, 6H + out_w), f32
    out_ref,              # packed output (tm, out_w) = [actions | mean | std | 0]
    *, max_action, hidden, action_dim, out_width, compute_dtype,
):
    H = hidden
    A = action_dim

    # Static lane-slices of the packed bias row (all offsets 128-aligned).
    b1c = b_ref[:, 0:2 * H]
    b2 = b_ref[:, 2 * H:3 * H]
    b3 = b_ref[:, 3 * H:4 * H]
    lb2 = b_ref[:, 4 * H:5 * H]
    lb3 = b_ref[:, 5 * H:6 * H]
    bh = b_ref[:, 6 * H:6 * H + out_width]

    x = x_ref[...]

    # ---- fused first layer: one MXU push serves both branches (shared x) ----
    hg = jnp.dot(x, w1c_ref[...], preferred_element_type=jnp.float32)
    hg = jnp.maximum(hg + b1c, 0.0)
    h = hg[:, :H].astype(compute_dtype)    # mean-branch hidden
    g = hg[:, H:].astype(compute_dtype)    # log_std-branch hidden

    # ---- mean branch: fc2 -> fc3 ----
    h = jnp.maximum(
        jnp.dot(h, w2_ref[...], preferred_element_type=jnp.float32) + b2, 0.0
    ).astype(compute_dtype)
    h = jnp.maximum(
        jnp.dot(h, w3_ref[...], preferred_element_type=jnp.float32) + b3, 0.0
    ).astype(compute_dtype)

    # ---- log_std branch: lfc2 -> lfc3 ----
    g = jnp.maximum(
        jnp.dot(g, lw2_ref[...], preferred_element_type=jnp.float32) + lb2, 0.0
    ).astype(compute_dtype)
    g = jnp.maximum(
        jnp.dot(g, lw3_ref[...], preferred_element_type=jnp.float32) + lb3, 0.0
    ).astype(compute_dtype)

    # ---- fused head: lands directly in the packed 128-lane output layout.
    # raw lanes: [0:A) = mean, [A:2A) = mean, [2A:3A) = log_std, rest = 0.
    wh = wh_ref[...]
    raw = (jnp.dot(h, wh[:H, :], preferred_element_type=jnp.float32)
           + jnp.dot(g, wh[H:, :], preferred_element_type=jnp.float32)
           + bh)

    # Lane-masked epilogue: pure VPU/EUP work, no cross-lane concatenate.
    lane = jax.lax.broadcasted_iota(jnp.int32, raw.shape, dimension=1)
    actions = max_action * jnp.tanh(raw)              # valid on action lanes
    std = jnp.exp(jnp.clip(raw, -20.0, 2.0))          # valid on std lanes
    out = jnp.where(lane < A, actions, raw)                        # [0:A)
    out = jnp.where((lane >= 2 * A) & (lane < 3 * A), std, out)    # [2A:3A)
    # lanes [A:2A) stay raw (= mean); lanes >= 3A stay raw (= 0 by construction)
    out_ref[...] = out.astype(out_ref.dtype)


def actorgauss_forward(x, params, max_action, *, compute_dtype=jnp.bfloat16,
                       out_dtype=jnp.float32, row_tile=1024):
    """Fused actorgauss forward. Returns (actions, mean, std)."""
    # TODO(synk): torch.distributions.Normal(mean, std) has no array equivalent;
    # we return its (mean, std) parameters instead of a distribution object.
    B, in_dim = x.shape
    hidden = params["w1"].shape[1]
    A = params["wa"].shape[1]

    # Large pipeline tile (same on all generations -- the MXU M-tile does not
    # constrain the Pallas block).  When B <= row_tile, shrink so the grid has
    # >=2 steps when the batch allows it (keeps both v7x TensorCores busy).
    tm = max(8, min(row_tile, _round_up(pl.cdiv(B, 2), 8)))
    b_pad = _round_up(B, tm)
    nb = b_pad // tm
    x_pad = x if b_pad == B else jnp.pad(x, ((0, b_pad - B), (0, 0)))

    out_w = max(128, _round_up(3 * A, 128))   # lane-dense packed output slab
    wd = compute_dtype

    # Fused layer-1 weight: shared input x serves both branches.
    w1c = jnp.concatenate([params["w1"], params["lw1"]], axis=1).astype(wd)

    # Fused output head, columns pre-placed into the packed lane layout:
    #   lanes [0:A) and [A:2A) <- wa (mean twice: once for tanh, once raw)
    #   lanes [2A:3A)          <- ws (log_std)
    wh = jnp.zeros((2 * hidden, out_w), jnp.float32)
    wh = wh.at[:hidden, 0:A].set(params["wa"])
    wh = wh.at[:hidden, A:2 * A].set(params["wa"])
    wh = wh.at[hidden:, 2 * A:3 * A].set(params["ws"])
    wh = wh.astype(wd)

    # All biases packed into one resident f32 row (segments 128-aligned since
    # hidden and out_w are multiples of 128).  Order: b1 | lb1 | b2 | b3 |
    # lb2 | lb3 | head-bias.
    bh = jnp.zeros((1, out_w), jnp.float32)
    bh = bh.at[:, 0:A].set(params["ba"].reshape(1, -1))
    bh = bh.at[:, A:2 * A].set(params["ba"].reshape(1, -1))
    bh = bh.at[:, 2 * A:3 * A].set(params["bs"].reshape(1, -1))
    bias = jnp.concatenate(
        [params["b1"].reshape(1, -1), params["lb1"].reshape(1, -1),
         params["b2"].reshape(1, -1), params["b3"].reshape(1, -1),
         params["lb2"].reshape(1, -1), params["lb3"].reshape(1, -1), bh],
        axis=1).astype(jnp.float32)

    weights = [
        w1c,
        params["w2"].astype(wd), params["w3"].astype(wd),
        params["lw2"].astype(wd), params["lw3"].astype(wd),
        wh, bias,
    ]
    x_in = x_pad.astype(wd)

    def resident(a):
        # Full-array block, constant block index -> DMA'd once, VMEM-resident
        # across grid steps.  (Default double-buffering kept: <1 MiB cost.)
        return pl.BlockSpec(a.shape, lambda i: (0, 0))

    in_specs = ([pl.BlockSpec((tm, in_dim), lambda i: (i, 0))]
                + [resident(a) for a in weights])
    out_specs = pl.BlockSpec((tm, out_w), lambda i: (i, 0))

    kernel = functools.partial(
        _actor_kernel, max_action=float(max_action), hidden=hidden,
        action_dim=A, out_width=out_w, compute_dtype=wd)

    # VMEM budget derived from actual sizes: resident weights (2x for default
    # double buffer), streamed x/out tiles (2x), headroom for f32 intermediates.
    out_isize = jnp.dtype(out_dtype).itemsize
    weight_bytes = sum(int(a.size) * a.dtype.itemsize for a in weights)
    stream_bytes = 2 * tm * (in_dim * x_in.dtype.itemsize + out_w * out_isize)
    interm_bytes = tm * hidden * 4 * 8
    vmem_limit = int(min(48 << 20,
                         max(24 << 20,
                             2 * weight_bytes + stream_bytes + interm_bytes)))

    flops = 2 * b_pad * (in_dim * 2 * hidden + 4 * hidden * hidden
                         + 2 * hidden * out_w)
    bytes_accessed = (x_in.size * x_in.dtype.itemsize + weight_bytes
                      + b_pad * out_w * out_isize)
    cost = pl.CostEstimate(flops=flops, transcendentals=2 * b_pad * out_w,
                           bytes_accessed=bytes_accessed)

    packed = pl.pallas_call(
        kernel,
        out_shape=jax.ShapeDtypeStruct((b_pad, out_w), out_dtype),
        grid=(nb,),
        in_specs=in_specs,
        out_specs=out_specs,
        compiler_params=pltpu.CompilerParams(
            dimension_semantics=("parallel",),   # batch rows independent
            vmem_limit_bytes=vmem_limit,
        ),
        cost_estimate=cost,
    )(x_in, *weights)

    actions = packed[:B, 0:A]
    mean = packed[:B, A:2 * A]
    std = packed[:B, 2 * A:3 * A]
    return actions, mean, std


def _reference(x, params, max_action, compute_dtype=jnp.bfloat16):
    """Pure-JAX reference mirroring the kernel's bf16 matmul inputs / f32 accum."""
    wd = compute_dtype

    def lin(v, w, b):
        return jnp.dot(v.astype(wd), w.astype(wd),
                       preferred_element_type=jnp.float32) + b

    h = jnp.maximum(lin(x, params["w1"], params["b1"]), 0.0)
    h = jnp.maximum(lin(h, params["w2"], params["b2"]), 0.0)
    h = jnp.maximum(lin(h, params["w3"], params["b3"]), 0.0)
    mean = lin(h, params["wa"], params["ba"])
    actions = max_action * jnp.tanh(mean)
    g = jnp.maximum(lin(x, params["lw1"], params["lb1"]), 0.0)
    g = jnp.maximum(lin(g, params["lw2"], params["lb2"]), 0.0)
    g = jnp.maximum(lin(g, params["lw3"], params["lb3"]), 0.0)
    log_std = jnp.clip(lin(g, params["ws"], params["bs"]), -20.0, 2.0)
    std = jnp.exp(log_std)
    return actions, mean, std


def _xavier_uniform(key, fan_in, fan_out, gain=1.0):
    bound = gain * jnp.sqrt(6.0 / (fan_in + fan_out))
    # Stored (in, out) so the kernel does x @ W; matches torch's x @ W.T with
    # W_torch of shape (out, in).
    return jax.random.uniform(
        key, (fan_in, fan_out), jnp.float32, minval=-bound, maxval=bound)


def init_params(key, in_dim, action_dim, hidden=256):
    keys = jax.random.split(key, 8)
    p = {}
    # mean branch
    p["w1"] = _xavier_uniform(keys[0], in_dim, hidden)
    p["b1"] = jnp.zeros((1, hidden), jnp.float32)
    p["w2"] = _xavier_uniform(keys[1], hidden, hidden)
    p["b2"] = jnp.zeros((1, hidden), jnp.float32)
    p["w3"] = _xavier_uniform(keys[2], hidden, hidden)
    p["b3"] = jnp.zeros((1, hidden), jnp.float32)
    p["wa"] = _xavier_uniform(keys[3], hidden, action_dim)
    p["ba"] = jnp.zeros((1, action_dim), jnp.float32)
    # log_std branch
    p["lw1"] = _xavier_uniform(keys[4], in_dim, hidden)
    p["lb1"] = jnp.zeros((1, hidden), jnp.float32)
    p["lw2"] = _xavier_uniform(keys[5], hidden, hidden)
    p["lb2"] = jnp.zeros((1, hidden), jnp.float32)
    p["lw3"] = _xavier_uniform(keys[6], hidden, hidden)
    p["lb3"] = jnp.zeros((1, hidden), jnp.float32)
    p["ws"] = _xavier_uniform(keys[7], hidden, action_dim)
    p["bs"] = jnp.zeros((1, action_dim), jnp.float32)
    return p


if __name__ == "__main__":
    env_params = {"obs": 12, "goal": 4, "action": 4, "action_max": 1.0}
    batch = 8
    in_dim = env_params["obs"] + env_params["goal"]

    key = jax.random.PRNGKey(0)
    k_x, k_p = jax.random.split(key)

    x = jax.random.normal(k_x, (batch, in_dim), jnp.float32)
    params = init_params(k_p, in_dim, env_params["action"])

    actions, mean, std = actorgauss_forward(x, params, env_params["action_max"])
    jax.block_until_ready((actions, mean, std))

    # sanity checks
    assert actions.shape == (batch, env_params["action"])
    assert mean.shape == (batch, env_params["action"])
    assert std.shape == (batch, env_params["action"])
    assert bool(jnp.all(jnp.abs(actions) <= env_params["action_max"] + 1e-6))
    assert bool(jnp.all(std > 0))

    # numeric check against a bf16-matched pure-JAX reference
    ra, rm, rs = _reference(x, params, env_params["action_max"])
    assert bool(jnp.allclose(actions, ra, atol=2e-2, rtol=2e-2))
    assert bool(jnp.allclose(mean, rm, atol=2e-2, rtol=2e-2))
    assert bool(jnp.allclose(std, rs, atol=2e-2, rtol=2e-2))

    # exercise a multi-step grid (batch > tile logic, >=2 grid steps) as well
    x_big = jax.random.normal(k_x, (300, in_dim), jnp.float32)
    a2, m2, s2 = actorgauss_forward(x_big, params, env_params["action_max"])
    jax.block_until_ready((a2, m2, s2))
    ra2, rm2, rs2 = _reference(x_big, params, env_params["action_max"])
    assert bool(jnp.allclose(a2, ra2, atol=2e-2, rtol=2e-2))
    assert bool(jnp.allclose(s2, rs2, atol=2e-2, rtol=2e-2))

    print("KERNEL_OK")
</pallas_src>

<mosaic_0001>
module attributes {stable_mosaic.version = 11 : i64} {
  func.func @_actor_kernel(%arg0: i32, %arg1: memref<8x16xbf16, #tpu.memory_space<vmem>>, %arg2: memref<16x512xbf16, #tpu.memory_space<vmem>>, %arg3: memref<256x256xbf16, #tpu.memory_space<vmem>>, %arg4: memref<256x256xbf16, #tpu.memory_space<vmem>>, %arg5: memref<256x256xbf16, #tpu.memory_space<vmem>>, %arg6: memref<256x256xbf16, #tpu.memory_space<vmem>>, %arg7: memref<512x128xbf16, #tpu.memory_space<vmem>>, %arg8: memref<1x1664xf32, #tpu.memory_space<vmem>>, %arg9: memref<8x128xf32, #tpu.memory_space<vmem>>) attributes {dimension_semantics = [#tpu.dimension_semantics<parallel>], iteration_bounds = array<i64: 1>, scalar_prefetch = 0 : i64, scratch_operands = 0 : i64, tpu.core_type = #tpu.core_type<tc>, window_params = [{transform_indices = @transform_0, window_bounds = array<i64: 8, 16>}, {pipeline_mode = #tpu.pipeline_mode<synchronous>, transform_indices = @transform_1, window_bounds = array<i64: 16, 512>}, {pipeline_mode = #tpu.pipeline_mode<synchronous>, transform_indices = @transform_2, window_bounds = array<i64: 256, 256>}, {pipeline_mode = #tpu.pipeline_mode<synchronous>, transform_indices = @transform_3, window_bounds = array<i64: 256, 256>}, {pipeline_mode = #tpu.pipeline_mode<synchronous>, transform_indices = @transform_4, window_bounds = array<i64: 256, 256>}, {pipeline_mode = #tpu.pipeline_mode<synchronous>, transform_indices = @transform_5, window_bounds = array<i64: 256, 256>}, {pipeline_mode = #tpu.pipeline_mode<synchronous>, transform_indices = @transform_6, window_bounds = array<i64: 512, 128>}, {pipeline_mode = #tpu.pipeline_mode<synchronous>, transform_indices = @transform_7, window_bounds = array<i64: 1, 1664>}, {transform_indices = @transform_8, window_bounds = array<i64: 8, 128>}]} {
    %c0 = arith.constant 0 : index
    %c0_0 = arith.constant 0 : index
    %0 = vector.load %arg8[%c0, %c0_0] : memref<1x1664xf32, #tpu.memory_space<vmem>>, vector<1x512xf32>
    %c0_1 = arith.constant 0 : index
    %c512 = arith.constant 512 : index
    %1 = vector.load %arg8[%c0_1, %c512] : memref<1x1664xf32, #tpu.memory_space<vmem>>, vector<1x256xf32>
    %c0_2 = arith.constant 0 : index
    %c768 = arith.constant 768 : index
    %2 = vector.load %arg8[%c0_2, %c768] : memref<1x1664xf32, #tpu.memory_space<vmem>>, vector<1x256xf32>
    %c0_3 = arith.constant 0 : index
    %c1024 = arith.constant 1024 : index
    %3 = vector.load %arg8[%c0_3, %c1024] : memref<1x1664xf32, #tpu.memory_space<vmem>>, vector<1x256xf32>
    %c0_4 = arith.constant 0 : index
    %c1280 = arith.constant 1280 : index
    %4 = vector.load %arg8[%c0_4, %c1280] : memref<1x1664xf32, #tpu.memory_space<vmem>>, vector<1x256xf32>
    %c0_5 = arith.constant 0 : index
    %c1536 = arith.constant 1536 : index
    %5 = vector.load %arg8[%c0_5, %c1536] : memref<1x1664xf32, #tpu.memory_space<vmem>>, vector<1x128xf32>
    %c0_6 = arith.constant 0 : index
    %c0_7 = arith.constant 0 : index
    %6 = vector.load %arg1[%c0_6, %c0_7] : memref<8x16xbf16, #tpu.memory_space<vmem>>, vector<8x16xbf16>
    %c0_8 = arith.constant 0 : index
    %c0_9 = arith.constant 0 : index
    %7 = vector.load %arg2[%c0_8, %c0_9] : memref<16x512xbf16, #tpu.memory_space<vmem>>, vector<16x512xbf16>
    %cst = arith.constant dense<0.000000e+00> : vector<8x512xf32>
    %8 = tpu.matmul %6, %7, %cst {dimension_numbers = #tpu.dot_dimension_numbers<[1], [0], [0], [1], [0, 0, 1, 1], [], []>} : vector<8x16xbf16>, vector<16x512xbf16>, vector<8x512xf32> -> vector<8x512xf32>
    %9 = vector.broadcast %0 : vector<1x512xf32> to vector<8x512xf32>
    %10 = arith.addf %8, %9 : vector<8x512xf32>
    %cst_10 = arith.constant 0.000000e+00 : f32
    %11 = vector.broadcast %cst_10 : f32 to vector<8x512xf32>
    %12 = arith.maximumf %10, %11 : vector<8x512xf32>
    %13 = vector.extract_strided_slice %12 {offsets = [0, 0], sizes = [8, 256], strides = [1, 1]} : vector<8x512xf32> to vector<8x256xf32>
    %14 = arith.truncf %13 : vector<8x256xf32> to vector<8x256xbf16>
    %15 = vector.extract_strided_slice %12 {offsets = [0, 256], sizes = [8, 256], strides = [1, 1]} : vector<8x512xf32> to vector<8x256xf32>
    %16 = arith.truncf %15 : vector<8x256xf32> to vector<8x256xbf16>
    %c0_11 = arith.constant 0 : index
    %c0_12 = arith.constant 0 : index
    %17 = vector.load %arg3[%c0_11, %c0_12] : memref<256x256xbf16, #tpu.memory_space<vmem>>, vector<256x256xbf16>
    %cst_13 = arith.constant dense<0.000000e+00> : vector<8x256xf32>
    %18 = tpu.matmul %14, %17, %cst_13 {dimension_numbers = #tpu.dot_dimension_numbers<[1], [0], [0], [1], [0, 0, 1, 1], [], []>} : vector<8x256xbf16>, vector<256x256xbf16>, vector<8x256xf32> -> vector<8x256xf32>
    %19 = vector.broadcast %1 : vector<1x256xf32> to vector<8x256xf32>
    %20 = arith.addf %18, %19 : vector<8x256xf32>
    %cst_14 = arith.constant 0.000000e+00 : f32
    %21 = vector.broadcast %cst_14 : f32 to vector<8x256xf32>
    %22 = arith.maximumf %20, %21 : vector<8x256xf32>
    %23 = arith.truncf %22 : vector<8x256xf32> to vector<8x256xbf16>
    %c0_15 = arith.constant 0 : index
    %c0_16 = arith.constant 0 : index
    %24 = vector.load %arg4[%c0_15, %c0_16] : memref<256x256xbf16, #tpu.memory_space<vmem>>, vector<256x256xbf16>
    %cst_17 = arith.constant dense<0.000000e+00> : vector<8x256xf32>
    %25 = tpu.matmul %23, %24, %cst_17 {dimension_numbers = #tpu.dot_dimension_numbers<[1], [0], [0], [1], [0, 0, 1, 1], [], []>} : vector<8x256xbf16>, vector<256x256xbf16>, vector<8x256xf32> -> vector<8x256xf32>
    %26 = vector.broadcast %2 : vector<1x256xf32> to vector<8x256xf32>
    %27 = arith.addf %25, %26 : vector<8x256xf32>
    %cst_18 = arith.constant 0.000000e+00 : f32
    %28 = vector.broadcast %cst_18 : f32 to vector<8x256xf32>
    %29 = arith.maximumf %27, %28 : vector<8x256xf32>
    %30 = arith.truncf %29 : vector<8x256xf32> to vector<8x256xbf16>
    %c0_19 = arith.constant 0 : index
    %c0_20 = arith.constant 0 : index
    %31 = vector.load %arg5[%c0_19, %c0_20] : memref<256x256xbf16, #tpu.memory_space<vmem>>, vector<256x256xbf16>
    %cst_21 = arith.constant dense<0.000000e+00> : vector<8x256xf32>
    %32 = tpu.matmul %16, %31, %cst_21 {dimension_numbers = #tpu.dot_dimension_numbers<[1], [0], [0], [1], [0, 0, 1, 1], [], []>} : vector<8x256xbf16>, vector<256x256xbf16>, vector<8x256xf32> -> vector<8x256xf32>
    %33 = vector.broadcast %3 : vector<1x256xf32> to vector<8x256xf32>
    %34 = arith.addf %32, %33 : vector<8x256xf32>
    %cst_22 = arith.constant 0.000000e+00 : f32
    %35 = vector.broadcast %cst_22 : f32 to vector<8x256xf32>
    %36 = arith.maximumf %34, %35 : vector<8x256xf32>
    %37 = arith.truncf %36 : vector<8x256xf32> to vector<8x256xbf16>
    %c0_23 = arith.constant 0 : index
    %c0_24 = arith.constant 0 : index
    %38 = vector.load %arg6[%c0_23, %c0_24] : memref<256x256xbf16, #tpu.memory_space<vmem>>, vector<256x256xbf16>
    %cst_25 = arith.constant dense<0.000000e+00> : vector<8x256xf32>
    %39 = tpu.matmul %37, %38, %cst_25 {dimension_numbers = #tpu.dot_dimension_numbers<[1], [0], [0], [1], [0, 0, 1, 1], [], []>} : vector<8x256xbf16>, vector<256x256xbf16>, vector<8x256xf32> -> vector<8x256xf32>
    %40 = vector.broadcast %4 : vector<1x256xf32> to vector<8x256xf32>
    %41 = arith.addf %39, %40 : vector<8x256xf32>
    %cst_26 = arith.constant 0.000000e+00 : f32
    %42 = vector.broadcast %cst_26 : f32 to vector<8x256xf32>
    %43 = arith.maximumf %41, %42 : vector<8x256xf32>
    %44 = arith.truncf %43 : vector<8x256xf32> to vector<8x256xbf16>
    %c0_27 = arith.constant 0 : index
    %c0_28 = arith.constant 0 : index
    %45 = vector.load %arg7[%c0_27, %c0_28] : memref<512x128xbf16, #tpu.memory_space<vmem>>, vector<512x128xbf16>
    %46 = vector.extract_strided_slice %45 {offsets = [0, 0], sizes = [256, 128], strides = [1, 1]} : vector<512x128xbf16> to vector<256x128xbf16>
    %cst_29 = arith.constant dense<0.000000e+00> : vector<8x128xf32>
    %47 = tpu.matmul %30, %46, %cst_29 {dimension_numbers = #tpu.dot_dimension_numbers<[1], [0], [0], [1], [0, 0, 1, 1], [], []>} : vector<8x256xbf16>, vector<256x128xbf16>, vector<8x128xf32> -> vector<8x128xf32>
    %48 = vector.extract_strided_slice %45 {offsets = [256, 0], sizes = [256, 128], strides = [1, 1]} : vector<512x128xbf16> to vector<256x128xbf16>
    %cst_30 = arith.constant dense<0.000000e+00> : vector<8x128xf32>
    %49 = tpu.matmul %44, %48, %cst_30 {dimension_numbers = #tpu.dot_dimension_numbers<[1], [0], [0], [1], [0, 0, 1, 1], [], []>} : vector<8x256xbf16>, vector<256x128xbf16>, vector<8x128xf32> -> vector<8x128xf32>
    %50 = arith.addf %47, %49 : vector<8x128xf32>
    %51 = vector.broadcast %5 : vector<1x128xf32> to vector<8x128xf32>
    %52 = arith.addf %50, %51 : vector<8x128xf32>
    %53 = tpu.iota {dimensions = array<i32: 1>} : vector<8x128xi32>
    %54 = math.tanh %52 : vector<8x128xf32>
    %cst_31 = arith.constant 1.000000e+00 : f32
    %55 = vector.broadcast %cst_31 : f32 to vector<8x128xf32>
    %56 = arith.mulf %55, %54 : vector<8x128xf32>
    %cst_32 = arith.constant -2.000000e+01 : f32
    %cst_33 = arith.constant 2.000000e+00 : f32
    %57 = vector.broadcast %cst_32 : f32 to vector<8x128xf32>
    %58 = arith.maximumf %57, %52 : vector<8x128xf32>
    %59 = vector.broadcast %cst_33 : f32 to vector<8x128xf32>
    %60 = arith.minimumf %59, %58 : vector<8x128xf32>
    %61 = math.exp %60 : vector<8x128xf32>
    %c4_i32 = arith.constant 4 : i32
    %62 = vector.broadcast %c4_i32 : i32 to vector<8x128xi32>
    %63 = arith.cmpi slt, %53, %62 : vector<8x128xi32>
    %64 = arith.select %63, %56, %52 : vector<8x128xi1>, vector<8x128xf32>
    %c8_i32 = arith.constant 8 : i32
    %65 = vector.broadcast %c8_i32 : i32 to vector<8x128xi32>
    %66 = arith.cmpi sge, %53, %65 : vector<8x128xi32>
    %c12_i32 = arith.constant 12 : i32
    %67 = vector.broadcast %c12_i32 : i32 to vector<8x128xi32>
    %68 = arith.cmpi slt, %53, %67 : vector<8x128xi32>
    %69 = arith.andi %66, %68 : vector<8x128xi1>
    %70 = arith.select %69, %61, %64 : vector<8x128xi1>, vector<8x128xf32>
    %c0_34 = arith.constant 0 : index
    %c0_35 = arith.constant 0 : index
    %71 = vector.load %arg9[%c0_34, %c0_35] : memref<8x128xf32, #tpu.memory_space<vmem>>, vector<8x128xf32>
    tpu.vector_store %arg9[%c0_34, %c0_35], %70 {strides = array<i32>} : memref<8x128xf32, #tpu.memory_space<vmem>>, vector<8x128xf32>,
    return
  }
  func.func @transform_0(%arg0: i32) -> (i32, i32) {
    %c0_i32 = arith.constant 0 : i32
    %c0_i32_0 = arith.constant 0 : i32
    return %arg0, %c0_i32 : i32, i32
  }
  func.func @transform_1(%arg0: i32) -> (i32, i32) {
    %c0_i32 = arith.constant 0 : i32
    %c0_i32_0 = arith.constant 0 : i32
    %c0_i32_1 = arith.constant 0 : i32
    return %c0_i32, %c0_i32_0 : i32, i32
  }
  func.func @transform_2(%arg0: i32) -> (i32, i32) {
    %c0_i32 = arith.constant 0 : i32
    %c0_i32_0 = arith.constant 0 : i32
    %c0_i32_1 = arith.constant 0 : i32
    return %c0_i32, %c0_i32_0 : i32, i32
  }
  func.func @transform_3(%arg0: i32) -> (i32, i32) {
    %c0_i32 = arith.constant 0 : i32
    %c0_i32_0 = arith.constant 0 : i32
    %c0_i32_1 = arith.constant 0 : i32
    return %c0_i32, %c0_i32_0 : i32, i32
  }
  func.func @transform_4(%arg0: i32) -> (i32, i32) {
    %c0_i32 = arith.constant 0 : i32
    %c0_i32_0 = arith.constant 0 : i32
    %c0_i32_1 = arith.constant 0 : i32
    return %c0_i32, %c0_i32_0 : i32, i32
  }
  func.func @transform_5(%arg0: i32) -> (i32, i32) {
    %c0_i32 = arith.constant 0 : i32
    %c0_i32_0 = arith.constant 0 : i32
    %c0_i32_1 = arith.constant 0 : i32
    return %c0_i32, %c0_i32_0 : i32, i32
  }
  func.func @transform_6(%arg0: i32) -> (i32, i32) {
    %c0_i32 = arith.constant 0 : i32
    %c0_i32_0 = arith.constant 0 : i32
    %c0_i32_1 = arith.constant 0 : i32
    return %c0_i32, %c0_i32_0 : i32, i32
  }
  func.func @transform_7(%arg0: i32) -> (i32, i32) {
    %c0_i32 = arith.constant 0 : i32
    %c0_i32_0 = arith.constant 0 : i32
    %c0_i32_1 = arith.constant 0 : i32
    return %c0_i32, %c0_i32_0 : i32, i32
  }
  func.func @transform_8(%arg0: i32) -> (i32, i32) {
    %c0_i32 = arith.constant 0 : i32
    %c0_i32_0 = arith.constant 0 : i32
    return %arg0, %c0_i32 : i32, i32
  }
}

</mosaic_0001>

<bundles_post_ra>
// kernel: tpu_custom_call.1
= control target key start
LH: loop header
LB: loop body
LE: loop exit
PB: predicated region body
PF: predicated region fallthrough
CT: control target
= control target key end

     0   :  { %13 = vsyncpa [#allocation3], 0  ;;  %s2434_s0 = inlined_call_operand.hbm [shape: bf16[8,16], index: 0, kind: input, shape index: {}]   ;;  %s2435_s1 = inlined_call_operand.hbm [shape: bf16[16,512], index: 1, kind: input, shape index: {}]   ;;  %s2436_s2 = inlined_call_operand.hbm [shape: bf16[256,256], index: 2, kind: input, shape index: {}]   ;;  %s2437_s3 = inlined_call_operand.hbm [shape: bf16[256,256], index: 3, kind: input, shape index: {}]   ;;  %s2438_s4 = inlined_call_operand.hbm [shape: bf16[256,256], index: 4, kind: input, shape index: {}]   ;;  %s2439_s5 = inlined_call_operand.hbm [shape: bf16[256,256], index: 5, kind: input, shape index: {}]   ;;  %s2440_s6 = inlined_call_operand.hbm [shape: bf16[512,128], index: 6, kind: input, shape index: {}]   ;;  %s2441_s7 = inlined_call_operand.hbm [shape: f32[1,1664], index: 7, kind: input, shape index: {}]   ;;  %s2442_s8 = inlined_call_operand.hbm [shape: f32[8,128], index: 8, kind: output, shape index: {}]  }
   0x1   :  { %14 = vsyncpa [#allocation6], 0 }
   0x2   :  { %15 = vsyncpa [#allocation9], 0 }
   0x3   :  { %16 = vsyncpa [#allocation12], 0 }
   0x4   :  { %17 = vsyncpa [#allocation15], 0 }
   0x5   :  { %18 = vsyncpa [#allocation4], 0  ;;  %s2303_s27 = smov [#allocation5]  }
   0x6   :  { %s34_s28 = sshll.u32 %s2303_s27, 4  ;;  %s35_s28 = int_to_ptr.vmem [resolvable:$true] %s34_s28 }
   0x7   :  { %s2119_s29 = scalar_lea.vmem %s35_s28, 512  ;;  %p2124_p1 = scmp.lt.s32.totalorder %s35_s28, %s35_s28 }
   0x8   :  { %p2120_p0 = scmp.ne.s32.totalorder %s35_s28, %s2119_s29  ;;  %p2125_p2 = scmp.lt.s32.totalorder %s2119_s29, %s2119_s29 }
   0xa   :  { %p2126_p3 = por %p2125_p2, %p2124_p1 }
   0xc   :  { %p2127_p4 = pnand %p2126_p3, %p2120_p0 }
   0xe   :  { %2130 = shalt.err (!%p2127_p4)
}
   0xf   :  { %s2304_s30 = smov 256   ;;  %s2305_s9 = smov 16  }
  0x10   :  { %40 = dma.hbm_to_vmem [thread:$0]  %s2435_s1, 512, %s35_s28, [#allocation6], %s2304_s30, %s2304_s30, %s2305_s9  }
  0x11   :  { %s2306_s12 = smov [#allocation8]   ;;  %s2307_s14 = smov [#allocation11]  }
  0x12   :  { %s58_s13 = sshll.u32 %s2306_s12, 4  ;;  %s82_s15 = sshll.u32 %s2307_s14, 4  ;;  %s59_s13 = int_to_ptr.vmem [resolvable:$true] %s58_s13  ;;  %s83_s15 = int_to_ptr.vmem [resolvable:$true] %s82_s15 }
  0x13   :  { %s2139_s16 = scalar_lea.vmem %s59_s13, 4096  ;;  %p2144_p6 = scmp.lt.s32.totalorder %s59_s13, %s59_s13 }
  0x14   :  { %p2140_p5 = scmp.ne.s32.totalorder %s59_s13, %s2139_s16  ;;  %p2145_p7 = scmp.lt.s32.totalorder %s2139_s16, %s2139_s16 }
  0x16   :  { %p2146_p8 = por %p2145_p7, %p2144_p6 }
  0x18   :  { %p2147_p9 = pnand %p2146_p8, %p2140_p5 }
  0x1a   :  { %2150 = shalt.err (!%p2147_p9)
}
  0x1b   :  { %s2308_s17 = smov 128   ;;  %s2309_s18 = smov 8  }
  0x1c   :  { %64 = dma.hbm_to_vmem [thread:$0]  %s2437_s3, 4096, %s59_s13, [#allocation9], %s2308_s17, %s2308_s17, %s2309_s18  }
  0x1d   :  { %s2159_s1 = scalar_lea.vmem %s83_s15, 4096  ;;  %p2164_p11 = scmp.lt.s32.totalorder %s83_s15, %s83_s15 }
  0x1e   :  { %p2160_p10 = scmp.ne.s32.totalorder %s83_s15, %s2159_s1  ;;  %p2165_p12 = scmp.lt.s32.totalorder %s2159_s1, %s2159_s1 }
  0x20   :  { %p2166_p13 = por %p2165_p12, %p2164_p11 }
  0x22   :  { %p2167_p0 = pnand %p2166_p13, %p2160_p10 }
  0x24   :  { %2170 = shalt.err (!%p2167_p0)
}
  0x25   :  { %88 = dma.hbm_to_vmem [thread:$0]  %s2439_s5, 4096, %s83_s15, [#allocation12], %s2308_s17, %s2308_s17, %s2309_s18  }
  0x26   :  { %s2310_s23 = smov [#allocation2]   ;;  %s2311_s25 = smov [#allocation7]  }
  0x27   :  { %s25_s24 = sshll.u32 %s2310_s23, 4  ;;  %s46_s3 = sshll.u32 %s2311_s25, 4  ;;  %s26_s24 = int_to_ptr.vmem [resolvable:$true] %s25_s24  ;;  %s47_s3 = int_to_ptr.vmem [resolvable:$true] %s46_s3 }
  0x28   :  { %s2179_s26 = scalar_lea.vmem %s26_s24, 64  ;;  %p2184_p2 = scmp.lt.s32.totalorder %s26_s24, %s26_s24 }
  0x29   :  { %p2180_p1 = scmp.ne.s32.totalorder %s26_s24, %s2179_s26  ;;  %p2185_p3 = scmp.lt.s32.totalorder %s2179_s26, %s2179_s26 }
  0x2b   :  { %p2186_p4 = por %p2185_p3, %p2184_p2 }
  0x2d   :  { %p2187_p5 = pnand %p2186_p4, %p2180_p1 }
  0x2f   :  { %2190 = shalt.err (!%p2187_p5)
}
  0x30   :  { %28 = dma.hbm_to_vmem [thread:$0]  %s2434_s0, 64, %s26_s24, [#allocation3]  }
  0x31   :  { %s2199_s29 = scalar_lea.vmem %s47_s3, 4096  ;;  %p2204_p7 = scmp.lt.s32.totalorder %s47_s3, %s47_s3 }
  0x32   :  { %p2200_p6 = scmp.ne.s32.totalorder %s47_s3, %s2199_s29  ;;  %p2205_p8 = scmp.lt.s32.totalorder %s2199_s29, %s2199_s29 }
  0x34   :  { %p2206_p9 = por %p2205_p8, %p2204_p7 }
  0x36   :  { %p2207_p10 = pnand %p2206_p9, %p2200_p6 }
  0x38   :  { %2210 = shalt.err (!%p2207_p10)
}
  0x39   :  { %52 = dma.hbm_to_vmem [thread:$0]  %s2436_s2, 4096, %s47_s3, [#allocation6], %s2308_s17, %s2308_s17, %s2309_s18  }
  0x3a   :  { %s2312_s9 = smov [#allocation10]   ;;  %s2313_s11 = smov [#allocation13]  }
  0x3b   :  { %s70_s10 = sshll.u32 %s2312_s9, 4  ;;  %s94_s0 = sshll.u32 %s2313_s11, 4  ;;  %s71_s10 = int_to_ptr.vmem [resolvable:$true] %s70_s10  ;;  %s95_s0 = int_to_ptr.vmem [resolvable:$true] %s94_s0 }
  0x3c   :  { %s2219_s12 = scalar_lea.vmem %s71_s10, 4096  ;;  %p2224_p12 = scmp.lt.s32.totalorder %s71_s10, %s71_s10 }
  0x3d   :  { %p2220_p11 = scmp.ne.s32.totalorder %s71_s10, %s2219_s12  ;;  %p2225_p13 = scmp.lt.s32.totalorder %s2219_s12, %s2219_s12 }
  0x3f   :  { %p2226_p0 = por %p2225_p13, %p2224_p12 }
  0x41   :  { %p2227_p1 = pnand %p2226_p0, %p2220_p11 }
  0x43   :  { %2230 = shalt.err (!%p2227_p1)
}
  0x44   :  { %76 = dma.hbm_to_vmem [thread:$0]  %s2438_s4, 4096, %s71_s10, [#allocation9], %s2308_s17, %s2308_s17, %s2309_s18  }
  0x45   :  { %s2239_s2 = scalar_lea.vmem %s95_s0, 4096  ;;  %p2244_p3 = scmp.lt.s32.totalorder %s95_s0, %s95_s0 }
  0x46   :  { %p2240_p2 = scmp.ne.s32.totalorder %s95_s0, %s2239_s2  ;;  %p2245_p4 = scmp.lt.s32.totalorder %s2239_s2, %s2239_s2 }
  0x48   :  { %p2246_p5 = por %p2245_p4, %p2244_p3 }
  0x4a   :  { %p2247_p6 = pnand %p2246_p5, %p2240_p2 }
  0x4c   :  { %2250 = shalt.err (!%p2247_p6)
}
  0x4d   :  { %s2314_s15 = smov 64   ;;  %s2315_s16 = smov 4  }
  0x4e   :  { %100 = dma.hbm_to_vmem [thread:$0]  %s2440_s6, 4096, %s95_s0, [#allocation12], %s2314_s15, %s2314_s15, %s2315_s16  }
  0x4f   :  { %s2316_s1 = smov [#allocation14]  }
  0x50   :  { %s107_s21 = sshll.u32 %s2316_s1, 4  ;;  %s108_s21 = int_to_ptr.vmem [resolvable:$true] %s107_s21 }
  0x51   :  { %s2259_s22 = scalar_lea.vmem %s108_s21, 208  ;;  %s2263_s4 = scalar_lea.vmem %s108_s21, 224 }
  0x52   :  { %p2260_p7 = scmp.ne.s32.totalorder %s108_s21, %s2259_s22  ;;  %p2264_p8 = scmp.lt.s32.totalorder %s108_s21, %s108_s21 }
  0x53   :  { %p2265_p9 = scmp.lt.s32.totalorder %s2263_s4, %s2259_s22 }
  0x55   :  { %p2266_p10 = por %p2265_p9, %p2264_p8 }
  0x57   :  { %p2267_p11 = pnand %p2266_p10, %p2260_p7 }
  0x59   :  { %2270 = shalt.err (!%p2267_p11)
}
  0x5a   :  { %110 = dma.hbm_to_vmem [thread:$0]  %s2441_s7, 208, %s108_s21, [#allocation15]  }
  0x5b   :  { %2291 = dma.done.wait [#allocation3], 64  }
  0x5c   :  { %2292 = vsyncadd [#allocation3], 4294967232 }
  0x5d   :  { %2293 = dma.done.wait [#allocation6], 4608  }
  0x5e   :  { %2294 = vsyncadd [#allocation6], 4294962688 }
  0x5f   :  { %2295 = dma.done.wait [#allocation9], 8192  }
  0x60   :  { %2296 = vsyncadd [#allocation9], 4294959104 }
  0x61   :  { %2297 = dma.done.wait [#allocation12], 8192  }
  0x62   :  { %2298 = vsyncadd [#allocation12], 4294959104 }
  0x63   :  { %2299 = dma.done.wait [#allocation15], 208  }
  0x64   :  { %2300 = vsyncadd [#allocation15], 4294967088  ;;  %v2317_v0 = vmov 0   ;;  %v1877_v1 = vld [vmem:[#allocation5 + $0x4] ss:$16 sps:$4 sm:$0xff]   ;;  %vm188_vm0 = vcmask 130048   ;;  %v148_v60 = vlaneseq }
  0x65   :  { %224 = vmatprep.mubr.bf16.mxu0 %v2317_v0  ;;  %265 = vmatprep.mubr.bf16.mxu1 %v2317_v0  ;;  %v1879_v2 = vld [vmem:[#allocation5] ss:$16 sps:$4 sm:$0xff]   ;;  %v142_v3 = vld [vmem:[#allocation2] sm:$0xf]  ;;  %v1882_v5 = vld [vmem:[#allocation5 + $0x8] ss:$16 sps:$4 sm:$0xff]  }
  0x66   :  { %206 = vmatprep.subr.bf16.mxu0 %v1877_v1  ;;  %v1880_v4 = vld [vmem:[#allocation5 + $0xc] ss:$16 sps:$4 sm:$0xff]   ;;  %v1883_v6 = vld [vmem:[#allocation7 + $0x70] ss:$8 sps:$4 sm:$0xff]   ;;  %v1886_v9 = vld [vmem:[#allocation7 + $0x60] ss:$8 sps:$4 sm:$0xff]  }
  0x67   :  { %207 = vmatpush1.bf16.msra.mxu0 %v1879_v2  ;;  %247 = vmatprep.subr.bf16.mxu1 %v1880_v4  ;;  %v1885_v7 = vld [vmem:[#allocation7 + $0x74] ss:$8 sps:$4 sm:$0xff]   ;;  %v1888_v8 = vld [vmem:[#allocation7 + $0x64] ss:$8 sps:$4 sm:$0xff]   ;;  %v1889_v11 = vld [vmem:[#allocation7 + $0x50] ss:$8 sps:$4 sm:$0xff]  }
  0x68   :  { %248 = vmatpush1.bf16.msra.mxu1 %v1882_v5  ;;  %485 = vmatprep.subr.bf16.mxu0 %v1885_v7  ;;  %v1891_v10 = vld [vmem:[#allocation7 + $0x54] ss:$8 sps:$4 sm:$0xff]   ;;  %v1894_v12 = vld [vmem:[#allocation7 + $0x44] ss:$8 sps:$4 sm:$0xff]   ;;  %v1892_v13 = vld [vmem:[#allocation7 + $0x40] ss:$8 sps:$4 sm:$0xff]  }
  0x69   :  { %v1897_v14 = vld [vmem:[#allocation7 + $0x34] ss:$8 sps:$4 sm:$0xff]   ;;  %v1895_v15 = vld [vmem:[#allocation7 + $0x30] ss:$8 sps:$4 sm:$0xff]   ;;  %v1900_v16 = vld [vmem:[#allocation7 + $0x24] ss:$8 sps:$4 sm:$0xff]  }
  0x6a   :  { %1654 = vmatmul.mubr.msk.bf16.vlgmr.msra.gmra.mxu0 %vm188_vm0, %v142_v3  ;;  %v1898_v17 = vld [vmem:[#allocation7 + $0x20] ss:$8 sps:$4 sm:$0xff]   ;;  %v1903_v18 = vld [vmem:[#allocation7 + $0x14] ss:$8 sps:$4 sm:$0xff]   ;;  %v1901_v19 = vld [vmem:[#allocation7 + $0x10] ss:$8 sps:$4 sm:$0xff]  }
  0x6b   :  { %486 = vmatpush1.bf16.msra.mxu0 %v1883_v6  ;;  %1655 = vmatmul.mubr.msk.bf16.vlgmr.msra.gmra.mxu1 %vm188_vm0, %v142_v3  ;;  %v1906_v20 = vld [vmem:[#allocation7 + $0x4] ss:$8 sps:$4 sm:$0xff]   ;;  %v1904_v21 = vld [vmem:[#allocation7] ss:$8 sps:$4 sm:$0xff]   ;;  %v1909_v22 = vld [vmem:[#allocation7 + $0xf4] ss:$8 sps:$4 sm:$0xff]  }
  0x6c   :  { %487 = vmatprep.subr.bf16.mxu0 %v1888_v8  ;;  %v1907_v23 = vld [vmem:[#allocation7 + $0xf0] ss:$8 sps:$4 sm:$0xff]   ;;  %v1912_v24 = vld [vmem:[#allocation7 + $0xe4] ss:$8 sps:$4 sm:$0xff]   ;;  %v1910_v25 = vld [vmem:[#allocation7 + $0xe0] ss:$8 sps:$4 sm:$0xff]  }
  0x6d   :  { %v1915_v26 = vld [vmem:[#allocation7 + $0xd4] ss:$8 sps:$4 sm:$0xff]   ;;  %v1913_v27 = vld [vmem:[#allocation7 + $0xd0] ss:$8 sps:$4 sm:$0xff]   ;;  %v1918_v28 = vld [vmem:[#allocation7 + $0xc4] ss:$8 sps:$4 sm:$0xff]  }
  0x6e   :  { %v1916_v29 = vld [vmem:[#allocation7 + $0xc0] ss:$8 sps:$4 sm:$0xff]   ;;  %v1921_v30 = vld [vmem:[#allocation7 + $0xb4] ss:$8 sps:$4 sm:$0xff]   ;;  %v1919_v31 = vld [vmem:[#allocation7 + $0xb0] ss:$8 sps:$4 sm:$0xff]  }
  0x6f   :  { %488 = vmatpush1.bf16.msra.mxu0 %v1886_v9  ;;  %v1924_v32 = vld [vmem:[#allocation7 + $0xa4] ss:$8 sps:$4 sm:$0xff]   ;;  %v1922_v33 = vld [vmem:[#allocation7 + $0xa0] ss:$8 sps:$4 sm:$0xff]   ;;  %v1927_v34 = vld [vmem:[#allocation7 + $0x94] ss:$8 sps:$4 sm:$0xff]  }
  0x70   :  { %489 = vmatprep.subr.bf16.mxu0 %v1891_v10  ;;  %v1925_v35 = vld [vmem:[#allocation7 + $0x90] ss:$8 sps:$4 sm:$0xff]   ;;  %v1930_v36 = vld [vmem:[#allocation7 + $0x84] ss:$8 sps:$4 sm:$0xff]   ;;  %v1928_v37 = vld [vmem:[#allocation7 + $0x80] ss:$8 sps:$4 sm:$0xff]  }
  0x71   :  { %v1933_v38 = vld [vmem:[#allocation10 + $0x74] ss:$8 sps:$4 sm:$0xff]   ;;  %v1979_v39 = vld [vmem:[#allocation8 + $0x70] ss:$8 sps:$4 sm:$0xff]   ;;  %v1984_v41 = vld [vmem:[#allocation8 + $0x64] ss:$8 sps:$4 sm:$0xff]  }
  0x72   :  { %v1981_v40 = vld [vmem:[#allocation8 + $0x74] ss:$8 sps:$4 sm:$0xff]   ;;  %v1982_v42 = vld [vmem:[#allocation8 + $0x60] ss:$8 sps:$4 sm:$0xff]   ;;  %v1985_v44 = vld [vmem:[#allocation8 + $0x50] ss:$8 sps:$4 sm:$0xff]  }
  0x73   :  { %490 = vmatpush1.bf16.msra.mxu0 %v1889_v11  ;;  %733 = vmatprep.subr.bf16.mxu1 %v1981_v40  ;;  %v1987_v43 = vld [vmem:[#allocation8 + $0x54] ss:$8 sps:$4 sm:$0xff]   ;;  %v1990_v45 = vld [vmem:[#allocation8 + $0x44] ss:$8 sps:$4 sm:$0xff]   ;;  %v1988_v46 = vld [vmem:[#allocation8 + $0x40] ss:$8 sps:$4 sm:$0xff]  }
  0x74   :  { %491 = vmatprep.subr.bf16.mxu0 %v1894_v12  ;;  %734 = vmatpush1.bf16.msra.mxu1 %v1979_v39  ;;  %v1993_v47 = vld [vmem:[#allocation8 + $0x34] ss:$8 sps:$4 sm:$0xff]   ;;  %v1991_v48 = vld [vmem:[#allocation8 + $0x30] ss:$8 sps:$4 sm:$0xff]   ;;  %v1996_v49 = vld [vmem:[#allocation8 + $0x24] ss:$8 sps:$4 sm:$0xff]  }
  0x75   :  { %735 = vmatprep.subr.bf16.mxu1 %v1984_v41  ;;  %v1994_v50 = vld [vmem:[#allocation8 + $0x20] ss:$8 sps:$4 sm:$0xff]   ;;  %v1999_v51 = vld [vmem:[#allocation8 + $0x14] ss:$8 sps:$4 sm:$0xff]   ;;  %v1997_v52 = vld [vmem:[#allocation8 + $0x10] ss:$8 sps:$4 sm:$0xff]  }
  0x76   :  { %v2002_v53 = vld [vmem:[#allocation8 + $0x4] ss:$8 sps:$4 sm:$0xff]   ;;  %v2000_v54 = vld [vmem:[#allocation8] ss:$8 sps:$4 sm:$0xff]   ;;  %v2005_v55 = vld [vmem:[#allocation8 + $0xf4] ss:$8 sps:$4 sm:$0xff]  }
  0x77   :  { %492 = vmatpush1.bf16.msra.mxu0 %v1892_v13  ;;  %v2003_v56 = vld [vmem:[#allocation8 + $0xf0] ss:$8 sps:$4 sm:$0xff]   ;;  %v2008_v57 = vld [vmem:[#allocation8 + $0xe4] ss:$8 sps:$4 sm:$0xff]   ;;  %v2006_v58 = vld [vmem:[#allocation8 + $0xe0] ss:$8 sps:$4 sm:$0xff]  }
  0x78   :  { %493 = vmatprep.subr.bf16.mxu0 %v1897_v14  ;;  %736 = vmatpush1.bf16.msra.mxu1 %v1982_v42  ;;  %v2011_v59 = vld [vmem:[#allocation8 + $0xd4] ss:$8 sps:$4 sm:$0xff]   ;;  %v2009_v61 = vld [vmem:[#allocation8 + $0xd0] ss:$8 sps:$4 sm:$0xff]   ;;  %v2014_v62 = vld [vmem:[#allocation8 + $0xc4] ss:$8 sps:$4 sm:$0xff]  }
  0x79   :  { %737 = vmatprep.subr.bf16.mxu1 %v1987_v43  ;;  %v2401_v63 = vshrl.u32 %v148_v60, 7  ;;  %v2012_v0 = vld [vmem:[#allocation8 + $0xc0] ss:$8 sps:$4 sm:$0xff]   ;;  %v2017_v1 = vld [vmem:[#allocation8 + $0xb4] ss:$8 sps:$4 sm:$0xff]   ;;  %s2318_s6 = smov [#allocation16]  }
  0x7a   :  { %v2015_v3 = vld [vmem:[#allocation8 + $0xb0] ss:$8 sps:$4 sm:$0xff]   ;;  %v2406_v4 = vld [vmem:[#allocation14] sm:$0xf]  ;;  %v2020_v5 = vld [vmem:[#allocation8 + $0xa4] ss:$8 sps:$4 sm:$0xff]  }
  0x7b   :  { %494 = vmatpush1.bf16.msra.mxu0 %v1895_v15  ;;  %v2404_v2 = vsub.s32 0, %v2401_v63  ;;  %v2409_v6 = vsub.s32 1, %v2401_v63  ;;  %v162_v8 = vsub.s32 3, %v2401_v63  ;;  %v2018_v9 = vld [vmem:[#allocation8 + $0xa0] ss:$8 sps:$4 sm:$0xff]   ;;  %s1637_s7 = sshll.u32 %s2318_s6, 4  ;;  %s1638_s7 = int_to_ptr.vmem [resolvable:$true] %s1637_s7 }
  0x7c   :  { %495 = vmatprep.subr.bf16.mxu0 %v1900_v16  ;;  %738 = vmatpush1.bf16.msra.mxu1 %v1985_v44  ;;  %v1946_v39 = vld [vmem:[#allocation10 + $0x20] ss:$8 sps:$4 sm:$0xff]   ;;  %v1951_v40 = vld [vmem:[#allocation10 + $0x14] ss:$8 sps:$4 sm:$0xff]   ;;  %v1949_v41 = vld [vmem:[#allocation10 + $0x10] ss:$8 sps:$4 sm:$0xff]   ;;  %p2276_p13 = scmp.lt.s32.totalorder %s1638_s7, %s1638_s7 }
  0x7d   :  { %739 = vmatprep.subr.bf16.mxu1 %v1990_v45  ;;  %v151_v7 = vrot.slane %v2406_v4, %v2404_v2  ;;  %v155_v10 = vrot.slane %v2406_v4, %v2409_v6  ;;  %v163_v13 = vrot.slane %v2406_v4, %v162_v8  ;;  %v1954_v42 = vld [vmem:[#allocation10 + $0x4] ss:$8 sps:$4 sm:$0xff]   ;;  %v1952_v43 = vld [vmem:[#allocation10] ss:$8 sps:$4 sm:$0xff]   ;;  %v1957_v44 = vld [vmem:[#allocation10 + $0xf4] ss:$8 sps:$4 sm:$0xff]  }
  0x7e   :  { %v1955_v45 = vld [vmem:[#allocation10 + $0xf0] ss:$8 sps:$4 sm:$0xff]   ;;  %v2029_v8 = vld [vmem:[#allocation11 + $0x74] ss:$8 sps:$4 sm:$0xff]   ;;  %s2271_s23 = scalar_lea.vmem %s1638_s7, 128 }
  0x7f   :  { %496 = vmatpush1.bf16.msra.mxu0 %v1898_v17  ;;  %p2272_p12 = scmp.ne.s32.totalorder %s1638_s7, %s2271_s23  ;;  %p2277_p0 = scmp.lt.s32.totalorder %s2271_s23, %s2271_s23 }
  0x80   :  { %497 = vmatprep.subr.bf16.mxu0 %v1903_v18  ;;  %740 = vmatpush1.bf16.msra.mxu1 %v1988_v46  ;;  %v1960_v46 = vld [vmem:[#allocation10 + $0xe4] ss:$8 sps:$4 sm:$0xff]  }
  0x81   :  { %741 = vmatprep.subr.bf16.mxu1 %v1993_v47  ;;  %v1958_v47 = vld [vmem:[#allocation10 + $0xe0] ss:$8 sps:$4 sm:$0xff]   ;;  %p2278_p1 = por %p2277_p0, %p2276_p13 }
  0x83   :  { %498 = vmatpush1.bf16.msra.mxu0 %v1901_v19  ;;  %p2279_p2 = pnand %p2278_p1, %p2272_p12 }
  0x84   :  { %499 = vmatprep.subr.bf16.mxu0 %v1906_v20  ;;  %742 = vmatpush1.bf16.msra.mxu1 %v1991_v48  ;;  %v1963_v48 = vld [vmem:[#allocation10 + $0xd4] ss:$8 sps:$4 sm:$0xff]  }
  0x85   :  { %743 = vmatprep.subr.bf16.mxu1 %v1996_v49  ;;  %v1961_v49 = vld [vmem:[#allocation10 + $0xd0] ss:$8 sps:$4 sm:$0xff]  }
  0x87   :  { %500 = vmatpush1.bf16.msra.mxu0 %v1904_v21 }
  0x88   :  { %501 = vmatprep.subr.bf16.mxu0 %v1909_v22  ;;  %744 = vmatpush1.bf16.msra.mxu1 %v1994_v50  ;;  %v1966_v50 = vld [vmem:[#allocation10 + $0xc4] ss:$8 sps:$4 sm:$0xff]  }
  0x89   :  { %745 = vmatprep.subr.bf16.mxu1 %v1999_v51  ;;  %v1964_v51 = vld [vmem:[#allocation10 + $0xc0] ss:$8 sps:$4 sm:$0xff]  }
  0x8b   :  { %502 = vmatpush2.bf16.msra.mxu0 %v1907_v23 }
  0x8c   :  { %503 = vmatprep.subr.bf16.mxu0 %v1912_v24  ;;  %746 = vmatpush1.bf16.msra.mxu1 %v1997_v52  ;;  %v1969_v52 = vld [vmem:[#allocation10 + $0xb4] ss:$8 sps:$4 sm:$0xff]  }
  0x8d   :  { %747 = vmatprep.subr.bf16.mxu1 %v2002_v53  ;;  %v1967_v53 = vld [vmem:[#allocation10 + $0xb0] ss:$8 sps:$4 sm:$0xff]  }
  0x8f   :  { %504 = vmatpush2.bf16.msra.mxu0 %v1910_v25  ;;  %v1931_v25 = vld [vmem:[#allocation10 + $0x70] ss:$8 sps:$4 sm:$0xff]  }
  0x90   :  { %505 = vmatprep.subr.bf16.mxu0 %v1915_v26  ;;  %748 = vmatpush1.bf16.msra.mxu1 %v2000_v54  ;;  %v158_v54 = vsub.s32 2, %v2401_v63 }
  0x91   :  { %749 = vmatprep.subr.bf16.mxu1 %v2005_v55  ;;  %v1972_v55 = vld [vmem:[#allocation10 + $0xa4] ss:$8 sps:$4 sm:$0xff]  }
  0x93   :  { %506 = vmatpush2.bf16.msra.mxu0 %v1913_v27 }
  0x94   :  { %507 = vmatprep.subr.bf16.mxu0 %v1918_v28  ;;  %750 = vmatpush2.bf16.msra.mxu1 %v2003_v56  ;;  %v1936_v28 = vld [vmem:[#allocation10 + $0x64] ss:$8 sps:$4 sm:$0xff]   ;;  %v1970_v56 = vld [vmem:[#allocation10 + $0xa0] ss:$8 sps:$4 sm:$0xff]  }
  0x95   :  { %751 = vmatprep.subr.bf16.mxu1 %v2008_v57  ;;  %v159_v57 = vrot.slane %v2406_v4, %v158_v54  ;;  %v2026_v4 = vld [vmem:[#allocation8 + $0x84] ss:$8 sps:$4 sm:$0xff]  }
  0x97   :  { %508 = vmatpush2.bf16.msra.mxu0 %v1916_v29 }
  0x98   :  { %509 = vmatprep.subr.bf16.mxu0 %v1921_v30  ;;  %752 = vmatpush2.bf16.msra.mxu1 %v2006_v58  ;;  %v1975_v58 = vld [vmem:[#allocation10 + $0x94] ss:$8 sps:$4 sm:$0xff]  }
  0x99   :  { %753 = vmatprep.subr.bf16.mxu1 %v2011_v59  ;;  %v1973_v59 = vld [vmem:[#allocation10 + $0x90] ss:$8 sps:$4 sm:$0xff]  }
  0x9b   :  { %510 = vmatpush2.bf16.msra.mxu0 %v1919_v31  ;;  %v1934_v31 = vld [vmem:[#allocation10 + $0x60] ss:$8 sps:$4 sm:$0xff]  }
  0x9c   :  { %511 = vmatprep.subr.bf16.mxu0 %v1924_v32  ;;  %754 = vmatpush2.bf16.msra.mxu1 %v2009_v61  ;;  %v1939_v32 = vld [vmem:[#allocation10 + $0x54] ss:$8 sps:$4 sm:$0xff]  }
  0x9d   :  { %755 = vmatprep.subr.bf16.mxu1 %v2014_v62  ;;  %v1978_v62 = vld [vmem:[#allocation10 + $0x84] ss:$8 sps:$4 sm:$0xff]  }
  0x9f   :  { %512 = vmatpush2.bf16.msra.mxu0 %v1922_v33  ;;  %v1937_v33 = vld [vmem:[#allocation10 + $0x50] ss:$8 sps:$4 sm:$0xff]  }
  0xa0   :  { %513 = vmatprep.subr.bf16.mxu0 %v1927_v34  ;;  %756 = vmatpush2.bf16.msra.mxu1 %v2012_v0  ;;  %v1942_v34 = vld [vmem:[#allocation10 + $0x44] ss:$8 sps:$4 sm:$0xff]   ;;  %v1976_v0 = vld [vmem:[#allocation10 + $0x80] ss:$8 sps:$4 sm:$0xff]  }
  0xa1   :  { %757 = vmatprep.subr.bf16.mxu1 %v2017_v1 }
  0xa3   :  { %514 = vmatpush2.bf16.msra.mxu0 %v1925_v35  ;;  %v1940_v35 = vld [vmem:[#allocation10 + $0x40] ss:$8 sps:$4 sm:$0xff]  }
  0xa4   :  { %515 = vmatprep.subr.bf16.mxu0 %v1930_v36  ;;  %758 = vmatpush2.bf16.msra.mxu1 %v2015_v3  ;;  %v1945_v36 = vld [vmem:[#allocation10 + $0x34] ss:$8 sps:$4 sm:$0xff]  }
  0xa5   :  { %759 = vmatprep.subr.bf16.mxu1 %v2020_v5  ;;  %v2023_v3 = vld [vmem:[#allocation8 + $0x94] ss:$8 sps:$4 sm:$0xff]   ;;  %v2021_v5 = vld [vmem:[#allocation8 + $0x90] ss:$8 sps:$4 sm:$0xff]  }
  0xa7   :  { %516 = vmatpush2.bf16.msra.mxu0 %v1928_v37  ;;  %v1943_v37 = vld [vmem:[#allocation10 + $0x30] ss:$8 sps:$4 sm:$0xff]  }
  0xa8   :  { %981 = vmatprep.subr.bf16.mxu0 %v1933_v38  ;;  %760 = vmatpush2.bf16.msra.mxu1 %v2018_v9  ;;  %v1948_v38 = vld [vmem:[#allocation10 + $0x24] ss:$8 sps:$4 sm:$0xff]  }
  0xa9   :  { %761 = vmatprep.subr.bf16.mxu1 %v2023_v3  ;;  %v137_v9 = vld [vmem:[#allocation14 + $0x4] sm:$0x3] }
  0xac   :  { %762 = vmatpush2.bf16.msra.mxu1 %v2021_v5  ;;  %v2076_v5 = vld [vmem:[#allocation13 + $0x38] sm:$0xff]  }
  0xad   :  { %763 = vmatprep.subr.bf16.mxu1 %v2026_v4 }
 0x12a   :  { %v226_v11 = vpop.f32.mrf.mxu0 }
 0x12b   :  { %v227_v12 = vadd.f32 %v226_v11, %v151_v7  ;;  %v2417_v15 = vpop.f32.mrf.mxu1  ;;  %v2024_v7 = vld [vmem:[#allocation8 + $0x80] ss:$8 sps:$4 sm:$0xff]   ;;  %v322_v11 = vrot.slane %v137_v9, %v2409_v6 }
 0x12c   :  { %v228_v14 = vpop.f32.mrf.mxu0  ;;  %v268_v61 = vadd.f32 %v2417_v15, %v159_v57  ;;  %764 = vmatpush2.bf16.msra.mxu1 %v2024_v7  ;;  %v2077_v7 = vld [vmem:[#allocation13 + $0x70] sm:$0xff]  }
 0x12d   :  { %v229_v16 = vadd.f32 %v228_v14, %v155_v10  ;;  %v274_v17 = vmax.f32 %v227_v12, 0.0  ;;  %v269_v19 = vpop.f32.mrf.mxu1  ;;  %1229 = vmatprep.subr.bf16.mxu1 %v2029_v8  ;;  %v318_v10 = vrot.slane %v137_v9, %v2404_v2  ;;  %v2078_v8 = vld [vmem:[#allocation13 + $0x30] sm:$0xff]   ;;  %v2079_v9 = vld [vmem:[#allocation13 + $0x68] sm:$0xff]  }
 0x12e   :  { %v230_v18 = vpop.f32.mrf.mxu0  ;;  %v270_v21 = vadd.f32 %v269_v19, %v163_v13  ;;  %v276_v1 = vmax.f32 %v268_v61, 0.0 }
 0x12f   :  { %v275_v20 = vmax.f32 %v229_v16, 0.0  ;;  %v271_v23 = vpop.f32.mrf.mxu1  ;;  %v278_v27 = vpack.c.bf16 %v274_v17, %v274_v17 }
 0x130   :  { %v231_v22 = vpop.f32.mrf.mxu0  ;;  %v277_v26 = vmax.f32 %v270_v21, 0.0  ;;  %v280_v63 = vpack.c.bf16 %v276_v1, %v276_v1  ;;  %v2027_v21 = vld [vmem:[#allocation11 + $0x70] ss:$8 sps:$4 sm:$0xff]   ;;  %v2032_v23 = vld [vmem:[#allocation11 + $0x64] ss:$8 sps:$4 sm:$0xff]  }
 0x131   :  { %v279_v24 = vpack.c.bf16 %v275_v20, %v275_v20  ;;  %v272_v29 = vpop.f32.mrf.mxu1 }
 0x132   :  { %v281_v30 = vpack.c.bf16 %v277_v26, %v277_v26  ;;  %v2033_v26 = vld [vmem:[#allocation11 + $0x50] ss:$8 sps:$4 sm:$0xff]   ;;  %v2041_v29 = vld [vmem:[#allocation11 + $0x34] ss:$8 sps:$4 sm:$0xff]  }
 0x133   :  { %517 = vmatprep.mubr.bf16.mxu0 %v279_v24  ;;  %v2030_v24 = vld [vmem:[#allocation11 + $0x60] ss:$8 sps:$4 sm:$0xff]  }
 0x134   :  { %518 = vmatmul.mubr.bf16.vlgmr.msra.gmra.mxu0 %v278_v27  ;;  %v2038_v27 = vld [vmem:[#allocation11 + $0x44] ss:$8 sps:$4 sm:$0xff]  }
 0x135   :  { %982 = vmatpush1.bf16.msra.mxu0 %v1931_v25  ;;  %1013 = vmatprep.mubr.bf16.mxu0 %v281_v30  ;;  %v2035_v25 = vld [vmem:[#allocation11 + $0x54] ss:$8 sps:$4 sm:$0xff]   ;;  %v2039_v30 = vld [vmem:[#allocation11 + $0x30] ss:$8 sps:$4 sm:$0xff]  }
 0x136   :  { %983 = vmatprep.subr.bf16.mxu0 %v1936_v28  ;;  %v2036_v28 = vld [vmem:[#allocation11 + $0x40] ss:$8 sps:$4 sm:$0xff]  }
 0x139   :  { %984 = vmatpush1.bf16.msra.mxu0 %v1934_v31  ;;  %v2044_v31 = vld [vmem:[#allocation11 + $0x24] ss:$8 sps:$4 sm:$0xff]  }
 0x13a   :  { %985 = vmatprep.subr.bf16.mxu0 %v1939_v32  ;;  %v2042_v32 = vld [vmem:[#allocation11 + $0x20] ss:$8 sps:$4 sm:$0xff]  }
 0x13d   :  { %986 = vmatpush1.bf16.msra.mxu0 %v1937_v33  ;;  %v2047_v33 = vld [vmem:[#allocation11 + $0x14] ss:$8 sps:$4 sm:$0xff]  }
 0x13e   :  { %987 = vmatprep.subr.bf16.mxu0 %v1942_v34  ;;  %v2045_v34 = vld [vmem:[#allocation11 + $0x10] ss:$8 sps:$4 sm:$0xff]  }
 0x141   :  { %988 = vmatpush1.bf16.msra.mxu0 %v1940_v35  ;;  %v2050_v35 = vld [vmem:[#allocation11 + $0x4] ss:$8 sps:$4 sm:$0xff]  }
 0x142   :  { %989 = vmatprep.subr.bf16.mxu0 %v1945_v36  ;;  %v2048_v36 = vld [vmem:[#allocation11] ss:$8 sps:$4 sm:$0xff]  }
 0x145   :  { %990 = vmatpush1.bf16.msra.mxu0 %v1943_v37  ;;  %v2053_v37 = vld [vmem:[#allocation11 + $0xf4] ss:$8 sps:$4 sm:$0xff]  }
 0x146   :  { %991 = vmatprep.subr.bf16.mxu0 %v1948_v38  ;;  %v2051_v38 = vld [vmem:[#allocation11 + $0xf0] ss:$8 sps:$4 sm:$0xff]  }
 0x149   :  { %992 = vmatpush1.bf16.msra.mxu0 %v1946_v39  ;;  %v2056_v39 = vld [vmem:[#allocation11 + $0xe4] ss:$8 sps:$4 sm:$0xff]  }
 0x14a   :  { %993 = vmatprep.subr.bf16.mxu0 %v1951_v40  ;;  %v2054_v40 = vld [vmem:[#allocation11 + $0xe0] ss:$8 sps:$4 sm:$0xff]  }
 0x14d   :  { %994 = vmatpush1.bf16.msra.mxu0 %v1949_v41  ;;  %v2059_v41 = vld [vmem:[#allocation11 + $0xd4] ss:$8 sps:$4 sm:$0xff]  }
 0x14e   :  { %995 = vmatprep.subr.bf16.mxu0 %v1954_v42  ;;  %v2057_v42 = vld [vmem:[#allocation11 + $0xd0] ss:$8 sps:$4 sm:$0xff]  }
 0x151   :  { %996 = vmatpush1.bf16.msra.mxu0 %v1952_v43  ;;  %v2062_v43 = vld [vmem:[#allocation11 + $0xc4] ss:$8 sps:$4 sm:$0xff]  }
 0x152   :  { %997 = vmatprep.subr.bf16.mxu0 %v1957_v44  ;;  %v2060_v44 = vld [vmem:[#allocation11 + $0xc0] ss:$8 sps:$4 sm:$0xff]  }
 0x155   :  { %998 = vmatpush2.bf16.msra.mxu0 %v1955_v45  ;;  %v2065_v45 = vld [vmem:[#allocation11 + $0xb4] ss:$8 sps:$4 sm:$0xff]  }
 0x156   :  { %999 = vmatprep.subr.bf16.mxu0 %v1960_v46  ;;  %v2063_v46 = vld [vmem:[#allocation11 + $0xb0] ss:$8 sps:$4 sm:$0xff]  }
 0x159   :  { %1000 = vmatpush2.bf16.msra.mxu0 %v1958_v47  ;;  %v2068_v47 = vld [vmem:[#allocation11 + $0xa4] ss:$8 sps:$4 sm:$0xff]  }
 0x15a   :  { %1001 = vmatprep.subr.bf16.mxu0 %v1963_v48  ;;  %v139_v48 = vld [vmem:[#allocation14 + $0x8] sm:$0x3] }
 0x15d   :  { %1002 = vmatpush2.bf16.msra.mxu0 %v1961_v49  ;;  %v2066_v49 = vld [vmem:[#allocation11 + $0xa0] ss:$8 sps:$4 sm:$0xff]  }
 0x15e   :  { %1003 = vmatprep.subr.bf16.mxu0 %v1966_v50  ;;  %v2071_v50 = vld [vmem:[#allocation11 + $0x94] ss:$8 sps:$4 sm:$0xff]  }
 0x161   :  { %1004 = vmatpush2.bf16.msra.mxu0 %v1964_v51  ;;  %v814_v51 = vrot.slane %v139_v48, %v2404_v2 }
 0x162   :  { %1005 = vmatprep.subr.bf16.mxu0 %v1969_v52  ;;  %v818_v52 = vrot.slane %v139_v48, %v2409_v6 }
 0x165   :  { %1006 = vmatpush2.bf16.msra.mxu0 %v1967_v53  ;;  %v2069_v53 = vld [vmem:[#allocation11 + $0x90] ss:$8 sps:$4 sm:$0xff]  }
 0x166   :  { %1007 = vmatprep.subr.bf16.mxu0 %v1972_v55  ;;  %v2074_v55 = vld [vmem:[#allocation11 + $0x84] ss:$8 sps:$4 sm:$0xff]  }
 0x169   :  { %1008 = vmatpush2.bf16.msra.mxu0 %v1970_v56 }
 0x16a   :  { %1009 = vmatprep.subr.bf16.mxu0 %v1975_v58 }
 0x16d   :  { %1010 = vmatpush2.bf16.msra.mxu0 %v1973_v59  ;;  %v2072_v59 = vld [vmem:[#allocation11 + $0x80] ss:$8 sps:$4 sm:$0xff]  }
 0x16e   :  { %1011 = vmatprep.subr.bf16.mxu0 %v1978_v62 }
 0x171   :  { %1012 = vmatpush2.bf16.msra.mxu0 %v1976_v0  ;;  %v2075_v0 = vld [vmem:[#allocation13 + $0x78] sm:$0xff]  }
 0x174   :  { %1014 = vmatmul.mubr.bf16.vlgmr.msra.gmra.mxu0 %v280_v63 }
 0x1f4   :  { %v519_v12 = vpop.f32.mrf.mxu0 }
 0x1f5   :  { %v520_v13 = vadd.f32 %v519_v12, %v318_v10  ;;  %v2080_v10 = vld [vmem:[#allocation13 + $0x28] sm:$0xff]   ;;  %v2082_v12 = vld [vmem:[#allocation13 + $0x20] sm:$0xff]  }
 0x1f6   :  { %v521_v14 = vpop.f32.mrf.mxu0 }
 0x1f7   :  { %v522_v15 = vadd.f32 %v521_v14, %v322_v11  ;;  %v526_v16 = vmax.f32 %v520_v13, 0.0  ;;  %v2081_v11 = vld [vmem:[#allocation13 + $0x60] sm:$0xff]   ;;  %v2083_v13 = vld [vmem:[#allocation13 + $0x58] sm:$0xff]  }
 0x1f8   :  { %v523_v17 = vpop.f32.mrf.mxu0  ;;  %v2091_v14 = vld [vmem:[#allocation13 + $0xf8] sm:$0xff]  }
 0x1f9   :  { %v527_v18 = vmax.f32 %v522_v15, 0.0  ;;  %v528_v22 = vpack.c.bf16 %v526_v16, %v526_v16  ;;  %v2092_v15 = vld [vmem:[#allocation13 + $0xb8] sm:$0xff]   ;;  %v2093_v16 = vld [vmem:[#allocation13 + $0xf0] sm:$0xff]   ;;  %1817 = vmatprep.subr.bf16.mxu0 %v2091_v14 }
 0x1fa   :  { %v524_v19 = vpop.f32.mrf.mxu0  ;;  %v2084_v17 = vld [vmem:[#allocation13 + $0x18] sm:$0xff]   ;;  %1818 = vmatpush3.bf16.msra.mxu0 %v2092_v15 }
 0x1fb   :  { %v529_v20 = vpack.c.bf16 %v527_v18, %v527_v18  ;;  %v2094_v18 = vld [vmem:[#allocation13 + $0xb0] sm:$0xff]   ;;  %1819 = vmatprep.subr.bf16.mxu0 %v2093_v16  ;;  %v1618_v16 = vand.u32 127, %v148_v60 }
 0x1fc   :  { %v2085_v19 = vld [vmem:[#allocation13 + $0x50] sm:$0xff]  }
 0x1fd   :  { %765 = vmatprep.mubr.bf16.mxu1 %v529_v20  ;;  %v2095_v20 = vld [vmem:[#allocation13 + $0xe8] sm:$0xff]   ;;  %vm1626_vm1 = vcmp.ge.s32.totalorder %v1618_v16, 8  ;;  %vm1627_vm2 = vcmp.lt.s32.totalorder %v1618_v16, 12  ;;  %vm1624_vm3 = vcmp.lt.s32.totalorder %v1618_v16, 4 }
 0x1fe   :  { %766 = vmatmul.mubr.bf16.vlgmr.msra.gmra.mxu1 %v528_v22  ;;  %1820 = vmatpush3.bf16.msra.mxu0 %v2094_v18  ;;  %v2096_v22 = vld [vmem:[#allocation13 + $0xa8] sm:$0xff]   ;;  %vm1628_vm4 = vmand %vm1626_vm1, %vm1627_vm2 }
 0x1ff   :  { %1230 = vmatpush1.bf16.msra.mxu1 %v2027_v21  ;;  %v2086_v21 = vld [vmem:[#allocation13 + $0x10] sm:$0xff]   ;;  %1821 = vmatprep.subr.bf16.mxu0 %v2095_v20 }
 0x200   :  { %1231 = vmatprep.subr.bf16.mxu1 %v2032_v23  ;;  %v2087_v23 = vld [vmem:[#allocation13 + $0x48] sm:$0xff]  }
 0x202   :  { %1822 = vmatpush3.bf16.msra.mxu0 %v2096_v22 }
 0x203   :  { %1232 = vmatpush1.bf16.msra.mxu1 %v2030_v24  ;;  %v2097_v24 = vld [vmem:[#allocation13 + $0xe0] sm:$0xff]  }
 0x204   :  { %1233 = vmatprep.subr.bf16.mxu1 %v2035_v25  ;;  %v2088_v25 = vld [vmem:[#allocation13 + $0x8] sm:$0xff]   ;;  %1823 = vmatprep.subr.bf16.mxu0 %v2097_v24 }
 0x207   :  { %1234 = vmatpush1.bf16.msra.mxu1 %v2033_v26  ;;  %v2098_v26 = vld [vmem:[#allocation13 + $0xa0] sm:$0xff]  }
 0x208   :  { %1235 = vmatprep.subr.bf16.mxu1 %v2038_v27  ;;  %v2089_v27 = vld [vmem:[#allocation13 + $0x40] sm:$0xff]   ;;  %1824 = vmatpush3.bf16.msra.mxu0 %v2098_v26 }
 0x20b   :  { %1236 = vmatpush1.bf16.msra.mxu1 %v2036_v28  ;;  %v2099_v28 = vld [vmem:[#allocation13 + $0xd8] sm:$0xff]  }
 0x20c   :  { %1237 = vmatprep.subr.bf16.mxu1 %v2041_v29  ;;  %v2090_v29 = vld [vmem:[#allocation13] sm:$0xff]   ;;  %1825 = vmatprep.subr.bf16.mxu0 %v2099_v28 }
 0x20f   :  { %1238 = vmatpush1.bf16.msra.mxu1 %v2039_v30  ;;  %v2100_v30 = vld [vmem:[#allocation13 + $0x98] sm:$0xff]  }
 0x210   :  { %1239 = vmatprep.subr.bf16.mxu1 %v2044_v31  ;;  %v2101_v31 = vld [vmem:[#allocation13 + $0xd0] sm:$0xff]   ;;  %1826 = vmatpush3.bf16.msra.mxu0 %v2100_v30 }
 0x211   :  { %1827 = vmatprep.subr.bf16.mxu0 %v2101_v31 }
 0x213   :  { %1240 = vmatpush1.bf16.msra.mxu1 %v2042_v32  ;;  %v2102_v32 = vld [vmem:[#allocation13 + $0x90] sm:$0xff]  }
 0x214   :  { %1241 = vmatprep.subr.bf16.mxu1 %v2047_v33  ;;  %1828 = vmatpush3.bf16.msra.mxu0 %v2102_v32  ;;  %v2103_v33 = vld [vmem:[#allocation13 + $0xc8] sm:$0xff]  }
 0x215   :  { %1829 = vmatprep.subr.bf16.mxu0 %v2103_v33 }
 0x217   :  { %1242 = vmatpush1.bf16.msra.mxu1 %v2045_v34  ;;  %v2104_v34 = vld [vmem:[#allocation13 + $0x88] sm:$0xff]  }
 0x218   :  { %1243 = vmatprep.subr.bf16.mxu1 %v2050_v35  ;;  %1830 = vmatpush3.bf16.msra.mxu0 %v2104_v34  ;;  %v2105_v35 = vld [vmem:[#allocation13 + $0xc0] sm:$0xff]  }
 0x219   :  { %1831 = vmatprep.subr.bf16.mxu0 %v2105_v35 }
 0x21b   :  { %1244 = vmatpush1.bf16.msra.mxu1 %v2048_v36  ;;  %v2106_v36 = vld [vmem:[#allocation13 + $0x80] sm:$0xff]  }
 0x21c   :  { %1245 = vmatprep.subr.bf16.mxu1 %v2053_v37  ;;  %1832 = vmatpush3.bf16.msra.mxu0 %v2106_v36  ;;  %v138_v37 = vld [vmem:[#allocation14 + $0x6] sm:$0x3] }
 0x21f   :  { %1246 = vmatpush2.bf16.msra.mxu1 %v2051_v38  ;;  %v566_v38 = vrot.slane %v138_v37, %v2404_v2 }
 0x220   :  { %1247 = vmatprep.subr.bf16.mxu1 %v2056_v39  ;;  %v570_v39 = vrot.slane %v138_v37, %v2409_v6 }
 0x223   :  { %1248 = vmatpush2.bf16.msra.mxu1 %v2054_v40 }
 0x224   :  { %1249 = vmatprep.subr.bf16.mxu1 %v2059_v41 }
 0x227   :  { %1250 = vmatpush2.bf16.msra.mxu1 %v2057_v42 }
 0x228   :  { %1251 = vmatprep.subr.bf16.mxu1 %v2062_v43 }
 0x22b   :  { %1252 = vmatpush2.bf16.msra.mxu1 %v2060_v44 }
 0x22c   :  { %1253 = vmatprep.subr.bf16.mxu1 %v2065_v45 }
 0x22f   :  { %1254 = vmatpush2.bf16.msra.mxu1 %v2063_v46 }
 0x230   :  { %1255 = vmatprep.subr.bf16.mxu1 %v2068_v47 }
 0x233   :  { %1256 = vmatpush2.bf16.msra.mxu1 %v2066_v49 }
 0x234   :  { %v1015_v54 = vpop.f32.mrf.mxu0  ;;  %1257 = vmatprep.subr.bf16.mxu1 %v2071_v50  ;;  %v140_v50 = vld [vmem:[#allocation14 + $0xa] sm:$0x3] }
 0x235   :  { %v1016_v56 = vadd.f32 %v1015_v54, %v814_v51  ;;  %v1062_v51 = vrot.slane %v140_v50, %v2404_v2 }
 0x236   :  { %v1017_v57 = vpop.f32.mrf.mxu0 }
 0x237   :  { %v1018_v58 = vadd.f32 %v1017_v57, %v818_v52  ;;  %1258 = vmatpush2.bf16.msra.mxu1 %v2069_v53  ;;  %v1022_v61 = vmax.f32 %v1016_v56, 0.0  ;;  %v1066_v52 = vrot.slane %v140_v50, %v2409_v6 }
 0x238   :  { %v1019_v62 = vpop.f32.mrf.mxu0  ;;  %1259 = vmatprep.subr.bf16.mxu1 %v2074_v55 }
 0x239   :  { %v1023_v1 = vmax.f32 %v1018_v58, 0.0  ;;  %v1024_v4 = vpack.c.bf16 %v1022_v61, %v1022_v61 }
 0x23a   :  { %v1020_v63 = vpop.f32.mrf.mxu0 }
 0x23b   :  { %v1025_v3 = vpack.c.bf16 %v1023_v1, %v1023_v1  ;;  %1260 = vmatpush2.bf16.msra.mxu1 %v2072_v59 }
 0x23c   :  { %1839 = vmatprep.subr.bf16.mxu1 %v2075_v0 }
 0x23d   :  { %1261 = vmatprep.mubr.bf16.mxu1 %v1025_v3 }
 0x23e   :  { %1262 = vmatmul.mubr.bf16.vlgmr.msra.gmra.mxu1 %v1024_v4 }
 0x23f   :  { %1840 = vmatpush3.bf16.msra.mxu1 %v2076_v5 }
 0x240   :  { %1841 = vmatprep.subr.bf16.mxu1 %v2077_v7 }
 0x243   :  { %1842 = vmatpush3.bf16.msra.mxu1 %v2078_v8  ;;  %v1816_v8 = vld [vmem:[#allocation14 + $0xc] ss:$0 sm:$0xff] }
 0x244   :  { %1843 = vmatprep.subr.bf16.mxu1 %v2079_v9 }
 0x247   :  { %1844 = vmatpush3.bf16.msra.mxu1 %v2080_v10 }
 0x248   :  { %1845 = vmatprep.subr.bf16.mxu1 %v2081_v11 }
 0x24b   :  { %1846 = vmatpush3.bf16.msra.mxu1 %v2082_v12 }
 0x24c   :  { %1847 = vmatprep.subr.bf16.mxu1 %v2083_v13 }
 0x24f   :  { %1848 = vmatpush3.bf16.msra.mxu1 %v2084_v17 }
 0x250   :  { %1849 = vmatprep.subr.bf16.mxu1 %v2085_v19 }
 0x253   :  { %1850 = vmatpush3.bf16.msra.mxu1 %v2086_v21 }
 0x254   :  { %1851 = vmatprep.subr.bf16.mxu1 %v2087_v23 }
 0x257   :  { %1852 = vmatpush3.bf16.msra.mxu1 %v2088_v25 }
 0x258   :  { %1853 = vmatprep.subr.bf16.mxu1 %v2089_v27 }
 0x25b   :  { %1854 = vmatpush3.bf16.msra.mxu1 %v2090_v29 }
 0x2be   :  { %v767_v40 = vpop.f32.mrf.mxu1 }
 0x2bf   :  { %v768_v41 = vadd.f32 %v767_v40, %v566_v38 }
 0x2c0   :  { %v769_v42 = vpop.f32.mrf.mxu1 }
 0x2c1   :  { %v770_v43 = vadd.f32 %v769_v42, %v570_v39  ;;  %v774_v44 = vmax.f32 %v768_v41, 0.0 }
 0x2c2   :  { %v771_v45 = vpop.f32.mrf.mxu1 }
 0x2c3   :  { %v775_v46 = vmax.f32 %v770_v43, 0.0  ;;  %v776_v49 = vpack.c.bf16 %v774_v44, %v774_v44 }
 0x2c4   :  { %v772_v47 = vpop.f32.mrf.mxu1 }
 0x2c5   :  { %v777_v48 = vpack.c.bf16 %v775_v46, %v775_v46 }
 0x2c7   :  { %1602 = vmatprep.mubr.bf16.mxu1 %v777_v48 }
 0x2c8   :  { %1603 = vmatmul.mubr.bf16.vlgmr.msra.gmra.mxu1 %v776_v49 }
 0x2fe   :  { %v1263_v53 = vpop.f32.mrf.mxu1 }
 0x2ff   :  { %v1264_v54 = vadd.f32 %v1263_v53, %v1062_v51 }
 0x300   :  { %v1265_v55 = vpop.f32.mrf.mxu1 }
 0x301   :  { %v1266_v56 = vadd.f32 %v1265_v55, %v1066_v52  ;;  %v1270_v57 = vmax.f32 %v1264_v54, 0.0 }
 0x302   :  { %v1267_v58 = vpop.f32.mrf.mxu1 }
 0x303   :  { %v1271_v59 = vmax.f32 %v1266_v56, 0.0  ;;  %v1272_v0 = vpack.c.bf16 %v1270_v57, %v1270_v57 }
 0x304   :  { %v1268_v61 = vpop.f32.mrf.mxu1 }
 0x305   :  { %v1273_v62 = vpack.c.bf16 %v1271_v59, %v1271_v59 }
 0x307   :  { %1466 = vmatprep.mubr.bf16.mxu0 %v1273_v62 }
 0x308   :  { %1467 = vmatmul.mubr.bf16.vlgmr.msra.gmra.mxu0 %v1272_v0 }
 0x388   :  { %v1855_v1 = vpop.f32.mrf.mxu1 }
 0x38a   :  { %v1856_v63 = vpop.f32.mrf.mxu1 }
 0x38b   :  { %v1857_v3 = vadd.f32 %v1856_v63, %v1855_v1 }
 0x38c   :  { %v1858_v5 = vpop.f32.mrf.mxu1 }
 0x38e   :  { %v1859_v4 = vpop.f32.mrf.mxu1 }
 0x3c8   :  { %v1833_v2 = vpop.f32.mrf.mxu0 }
 0x3ca   :  { %v1834_v7 = vpop.f32.mrf.mxu0 }
 0x3cb   :  { %v1835_v6 = vadd.f32 %v1834_v7, %v1833_v2 }
 0x3cc   :  { %v1836_v9 = vpop.f32.mrf.mxu0 }
 0x3cd   :  { %v1605_v10 = vadd.f32 %v1857_v3, %v1835_v6 }
 0x3ce   :  { %v1837_v11 = vpop.f32.mrf.mxu0 }
 0x3cf   :  { %v1616_v12 = vadd.f32 %v1816_v8, %v1605_v10 }
 0x3d1   :  { %v1620_v13 = vmax.f32 %v1616_v12, -20.0  ;;  %2107 = vtanh.f32 %v1616_v12 }
 0x3d3   :  { %v1621_v14 = vmin.f32 %v1620_v13, 2.0 }
 0x3d5   :  { %v1622_v15 = vmul.f32 1.442695, %v1621_v14 }
 0x3d7   :  { %2109 = vpow2.f32 %v1622_v15 }
 0x3de   :  { %v2108_v17 = vpop.eup %2107 }
 0x3df   :  { %v1625_v19 = vsel %vm1624_vm3, %v2108_v17, %v1616_v12 }
 0x3e4   :  { %v2110_v18 = vpop.eup %2109 }
 0x3e5   :  { %v1629_v20 = vsel %vm1628_vm4, %v2110_v18, %v1625_v19 }
 0x3e6   :  { %1630 = vst [vmem:[#allocation16] sm:$0xff] %v1629_v20 }
 0x3e7   :  { %2282 = shalt.err (!%p2279_p2)
}
 0x3e8   :  { %1640 = dma.vmem_to_hbm [thread:$0]  %s1638_s7, 128, %s2442_s8, [#allocation4]  }
 0x3e9   :  { %2301 = dma.done.wait [#allocation4], 128  }
 0x3ea   :  { %2302 = vsyncadd [#allocation4], 4294967168 }
 0x3eb   :  { %1644 = vsyncpa [#allocation3], 1 }
 0x3ec   :  { %1645 = vsyncpa [#allocation6], 1 }
 0x3ed   :  { %1646 = vsyncpa [#allocation9], 1 }
 0x3ee   :  { %1647 = vsyncpa [#allocation12], 1 }
 0x3ef   :  { %1648 = vsyncpa [#allocation15], 1 }
 0x3f0   :  { %1649 = vsyncpa [#allocation4], 1 }

</bundles_post_ra>
